<compile_context>
chip_gen: v5e
topology: v5e:2x2
jax: 0.10.0
libtpu: 0.0.40
codegen_flags: <defaults>
</compile_context>

<pallas_src>
import jax
import jax.numpy as jnp
from jax.experimental import pallas as pl
from jax.experimental.pallas import tpu as pltpu

_MIB = 1024 * 1024


# --------------------------------------------------------------------------------------
# Sizing helpers
# --------------------------------------------------------------------------------------
def _vmem_budget():
    """(physical VMEM bytes, per-step double-buffered block budget)."""
    try:
        cap = int(pltpu.get_tpu_info().vmem_capacity_bytes)
    except Exception:
        cap = 64 * _MIB                       # conservative (v7x-sized) default
    return cap, int(min(max(cap // 4, 8 * _MIB), 28 * _MIB))


def _vmem_limit(cap, needed_bytes):
    """Scoped-VMEM limit: what the kernel actually needs + headroom, capped to the part."""
    return int(max(32 * _MIB, min(needed_bytes + 4 * _MIB, cap)))


def _row_tile_candidates(H_out, W_out, s, flat_out):
    """Output-row tile sizes compatible with the (8, 128) block-shape rule."""
    H_in = H_out * s
    cands = []
    for th in range(1, H_out + 1):
        if H_out % th:
            continue
        th_in = th * s
        if not (th_in % 8 == 0 or th_in == H_in):
            continue
        if flat_out:
            ok = (th * W_out) % 128 == 0 or th == H_out
        else:
            ok = th % 8 == 0 or th == H_out
        if ok:
            cands.append(th)
    return cands                               # th == H_out always qualifies


def _choose_blocks(N, H_out, W_out, s, C_in, C_out, itemsize, flat_out, budget):
    """(batch_tile, row_tile): biggest blocks whose double-buffered in+out fit the budget."""
    W_in = W_out * s
    cands = _row_tile_candidates(H_out, W_out, s, flat_out)

    def blk_bytes(bt, th):
        in_b = bt * C_in * th * s * W_in * itemsize
        out_b = bt * C_out * th * W_out * itemsize
        return 2 * (in_b + out_b)              # double-buffered in + out

    fitting = [th for th in cands if blk_bytes(1, th) <= budget and th <= 64]
    # TODO(synk): for huge images with awkward W_out the only candidate is th == H_out;
    # a masked-tail tile would be budget-safer there.
    th = max(fitting) if fitting else min(cands)

    b_tile = 1
    for cand in range(2, min(N, 8) + 1):
        if N % cand == 0 and blk_bytes(cand, th) <= budget:
            b_tile = cand

    # v7x megacore: keep at least 2 grid steps whenever the problem allows it.
    if (N // b_tile) * (H_out // th) < 2:
        if b_tile > 1:
            divs = [d for d in range(1, b_tile) if N % d == 0]
            if divs:
                b_tile = max(divs)
        elif N == 1:
            smaller = [t for t in cands if t < th]
            if smaller:
                th = max(smaller)
    return b_tile, th


def _pool_matrix(W_in, W_out, s):
    """(W_in, W_out) averaging matrix: P[w, wo] = 1/(s*s) iff w // s == wo."""
    cols = jnp.arange(W_in, dtype=jnp.int32) // s
    onehot = cols[:, None] == jnp.arange(W_out, dtype=jnp.int32)[None, :]
    return onehot.astype(jnp.float32) / float(s * s)


# --------------------------------------------------------------------------------------
# Primary single-HBM-pass kernels (read NCHW directly)
# --------------------------------------------------------------------------------------
def _make_pool_conv_kernel(s):
    """AvgPool(s) + 1x1 conv on a raw NCHW row tile."""
    def kernel(x_ref, pw_ref, w_ref, b_ref, o_ref, p_scr):
        # x_ref : (B, C_in, th*s, W_in)    raw NCHW rows tile
        # pw_ref: (W_in, W_out) f32        W-averaging matrix (1/(s*s) folded in)
        # w_ref : (C_out, C_in) f32        1x1 conv weight
        # b_ref : (C_out, 1) f32           bias
        # o_ref : (B, C_out, th*W_out)     flattened-NCHW output tile (lane-dense)
        # p_scr : (C_in, B*th*W_out) f32   pooled block, flat HW on lanes
        B, C_in, TH_in, W_in = x_ref.shape
        TH = TH_in // s
        W_out = pw_ref.shape[1]
        T = TH * W_out
        pw = pw_ref[...]
        for i in range(B):
            # H-pool: s sublane-strided row reads, accumulated in f32.
            h = x_ref[i, :, pl.ds(0, TH, stride=s), :].astype(jnp.float32)
            for dy in range(1, s):
                h = h + x_ref[i, :, pl.ds(dy, TH, stride=s), :].astype(jnp.float32)
            # W-pool (and the 1/(s*s) scale) on the MXU.
            pooled = jnp.dot(h.reshape(C_in * TH, W_in), pw,
                             preferred_element_type=jnp.float32)
            pooled = pooled.reshape(C_in, TH, W_out)
            # Repack rows so the pooled tile has flattened HW on the lane dim.
            for r in range(TH):
                p_scr[:, i * T + r * W_out:i * T + (r + 1) * W_out] = pooled[:, r, :]
        # 1x1 conv: one MXU matmul for the whole step; bias broadcast exactly once.
        y = jnp.dot(w_ref[...], p_scr[...], preferred_element_type=jnp.float32) + b_ref[...]
        for i in range(B):
            o_ref[i] = y[:, i * T:(i + 1) * T].astype(o_ref.dtype)
    return kernel


def _make_pool_only_kernel(s):
    """AvgPool(s) only (identity 1x1 conv) on a raw NCHW row tile."""
    def kernel(x_ref, pw_ref, o_ref):
        B, C_in, TH_in, W_in = x_ref.shape
        TH = TH_in // s
        W_out = pw_ref.shape[1]
        pw = pw_ref[...]
        for i in range(B):
            h = x_ref[i, :, pl.ds(0, TH, stride=s), :].astype(jnp.float32)
            for dy in range(1, s):
                h = h + x_ref[i, :, pl.ds(dy, TH, stride=s), :].astype(jnp.float32)
            pooled = jnp.dot(h.reshape(C_in * TH, W_in), pw,
                             preferred_element_type=jnp.float32)
            o_ref[i] = pooled.reshape(C_in, TH, W_out).astype(o_ref.dtype)
    return kernel


def _conv1x1_kernel(x_ref, w_ref, b_ref, o_ref):
    """Pure 1x1 conv (stride == 1) on flattened-NCHW tiles."""
    w = w_ref[...]
    b = b_ref[...]
    for i in range(x_ref.shape[0]):
        y = jnp.dot(w, x_ref[i].astype(jnp.float32), preferred_element_type=jnp.float32)
        o_ref[i] = (y + b).astype(o_ref.dtype)


def _pool_conv_forward(x, w_f32, b_f32, s, cap, budget):
    N, C_in, H, W_in = x.shape
    C_out = w_f32.shape[0]
    H_out, W_out = H // s, W_in // s
    it = jnp.dtype(x.dtype).itemsize
    b_tile, th = _choose_blocks(N, H_out, W_out, s, C_in, C_out, it, True, budget)
    T = th * W_out
    grid = (N // b_tile, H_out // th)
    pw = _pool_matrix(W_in, W_out, s)
    work = 4 * (C_in * th * s * W_in + C_in * T + C_in * b_tile * T + C_out * b_tile * T)
    need = (2 * b_tile * (C_in * th * s * W_in + C_out * T) * it
            + (W_in * W_out + C_out * C_in + C_out) * 4 + work)
    params = pltpu.CompilerParams(dimension_semantics=("parallel", "parallel"),
                                  vmem_limit_bytes=_vmem_limit(cap, need))
    out_flat = pl.pallas_call(
        _make_pool_conv_kernel(s),
        out_shape=jax.ShapeDtypeStruct((N, C_out, H_out * W_out), x.dtype),
        grid_spec=pltpu.PrefetchScalarGridSpec(
            num_scalar_prefetch=0,
            grid=grid,
            in_specs=[
                pl.BlockSpec((b_tile, C_in, th * s, W_in), lambda nb, rh: (nb, 0, rh, 0)),
                pl.BlockSpec((W_in, W_out), lambda nb, rh: (0, 0)),
                pl.BlockSpec((C_out, C_in), lambda nb, rh: (0, 0)),
                pl.BlockSpec((C_out, 1), lambda nb, rh: (0, 0)),
            ],
            out_specs=pl.BlockSpec((b_tile, C_out, T), lambda nb, rh: (nb, 0, rh)),
            scratch_shapes=[pltpu.VMEM((C_in, b_tile * T), jnp.float32)],
        ),
        compiler_params=params,
    )(x, pw, w_f32, b_f32)
    return out_flat.reshape(N, C_out, H_out, W_out)


def _pool_only_forward(x, s, cap, budget):
    N, C_in, H, W_in = x.shape
    H_out, W_out = H // s, W_in // s
    it = jnp.dtype(x.dtype).itemsize
    b_tile, th = _choose_blocks(N, H_out, W_out, s, C_in, C_in, it, False, budget)
    grid = (N // b_tile, H_out // th)
    pw = _pool_matrix(W_in, W_out, s)
    work = 4 * (C_in * th * s * W_in + C_in * th * W_out)
    need = 2 * b_tile * C_in * (th * s * W_in + th * W_out) * it + W_in * W_out * 4 + work
    params = pltpu.CompilerParams(dimension_semantics=("parallel", "parallel"),
                                  vmem_limit_bytes=_vmem_limit(cap, need))
    return pl.pallas_call(
        _make_pool_only_kernel(s),
        out_shape=jax.ShapeDtypeStruct((N, C_in, H_out, W_out), x.dtype),
        grid_spec=pltpu.PrefetchScalarGridSpec(
            num_scalar_prefetch=0,
            grid=grid,
            in_specs=[
                pl.BlockSpec((b_tile, C_in, th * s, W_in), lambda nb, rh: (nb, 0, rh, 0)),
                pl.BlockSpec((W_in, W_out), lambda nb, rh: (0, 0)),
            ],
            out_specs=pl.BlockSpec((b_tile, C_in, th, W_out), lambda nb, rh: (nb, 0, rh, 0)),
        ),
        compiler_params=params,
    )(x, pw)


def _conv1x1_forward(x, w_f32, b_f32, cap, budget):
    N, C_in, H, W = x.shape
    C_out = w_f32.shape[0]
    HW = H * W
    it = jnp.dtype(x.dtype).itemsize
    b_tile, th = _choose_blocks(N, H, W, 1, C_in, C_out, it, True, budget)
    T = th * W
    grid = (N // b_tile, H // th)
    work = 4 * b_tile * (C_in + C_out) * T
    need = 2 * b_tile * (C_in + C_out) * T * it + (C_out * C_in + C_out) * 4 + work
    params = pltpu.CompilerParams(dimension_semantics=("parallel", "parallel"),
                                  vmem_limit_bytes=_vmem_limit(cap, need))
    out_flat = pl.pallas_call(
        _conv1x1_kernel,
        out_shape=jax.ShapeDtypeStruct((N, C_out, HW), x.dtype),
        grid_spec=pltpu.PrefetchScalarGridSpec(
            num_scalar_prefetch=0,
            grid=grid,
            in_specs=[
                pl.BlockSpec((b_tile, C_in, T), lambda nb, t: (nb, 0, t)),
                pl.BlockSpec((C_out, C_in), lambda nb, t: (0, 0)),
                pl.BlockSpec((C_out, 1), lambda nb, t: (0, 0)),
            ],
            out_specs=pl.BlockSpec((b_tile, C_out, T), lambda nb, t: (nb, 0, t)),
        ),
        compiler_params=params,
    )(x.reshape(N, C_in, HW), w_f32, b_f32)
    return out_flat.reshape(N, C_out, H, W)


# --------------------------------------------------------------------------------------
# Fallback path (previous known-good implementation, pools from a wrapper-side
# (N, s*s, C_in, HW) re-layout).  Only used if the single-pass kernels above fail to
# lower on the local jax/libtpu (e.g. strided VMEM loads unavailable).
# --------------------------------------------------------------------------------------
def _legacy_pool_conv_kernel(x_ref, w_ref, b_ref, o_ref):
    w = w_ref[...]
    b = b_ref[...]
    for i in range(x_ref.shape[0]):
        pooled = jnp.sum(x_ref[i].astype(jnp.float32), axis=0)           # (C_in, T)
        y = jnp.dot(w, pooled, preferred_element_type=jnp.float32)
        o_ref[i] = (y + b).astype(o_ref.dtype)


def _legacy_pool_kernel(inv_scale):
    def kernel(x_ref, o_ref):
        o_ref[...] = (jnp.sum(x_ref[...].astype(jnp.float32), axis=1)
                      * inv_scale).astype(o_ref.dtype)
    return kernel


def _legacy_choose_tiles(N, HW, SS, C_in, C_out, itemsize, budget):
    col_bytes = 2 * (SS * C_in + C_out) * itemsize

    def fits(bt, t):
        return bt * t * col_bytes <= budget

    if HW % 128 != 0 or fits(1, HW):
        t_hw = HW
    else:
        t_hw = 128
        cand = 256
        while cand <= HW:
            if HW % cand == 0 and fits(1, cand):
                t_hw = cand
            cand += 128
    b_tile = 1
    for cand in range(2, min(N, 8) + 1):
        if N % cand == 0 and fits(cand, t_hw):
            b_tile = cand
    return b_tile, t_hw


def _legacy_forward(x, w_f32, b_f32, s, apply_conv, cap, budget):
    N, C_in, H, W = x.shape
    H_out, W_out = H // s, W // s
    HW = H_out * W_out
    SS = s * s
    C_out = w_f32.shape[0] if apply_conv else C_in
    xp = x.reshape(N, C_in, H_out, s, W_out, s)
    xp = jnp.transpose(xp, (0, 3, 5, 1, 2, 4)).reshape(N, SS, C_in, HW)
    it = jnp.dtype(x.dtype).itemsize
    b_tile, t_hw = _legacy_choose_tiles(N, HW, SS, C_in, C_out, it, budget)
    grid = (N // b_tile, HW // t_hw)
    need = (2 * b_tile * t_hw * (SS * C_in + C_out) * it
            + (C_out * C_in + C_out) * 4 + 4 * t_hw * (C_in + C_out))
    params = pltpu.CompilerParams(dimension_semantics=("parallel", "parallel"),
                                  vmem_limit_bytes=_vmem_limit(cap, need))
    if apply_conv:
        out_flat = pl.pallas_call(
            _legacy_pool_conv_kernel,
            out_shape=jax.ShapeDtypeStruct((N, C_out, HW), x.dtype),
            grid_spec=pltpu.PrefetchScalarGridSpec(
                num_scalar_prefetch=0, grid=grid,
                in_specs=[pl.BlockSpec((b_tile, SS, C_in, t_hw), lambda nb, t: (nb, 0, 0, t)),
                          pl.BlockSpec((C_out, C_in), lambda nb, t: (0, 0)),
                          pl.BlockSpec((C_out, 1), lambda nb, t: (0, 0))],
                out_specs=pl.BlockSpec((b_tile, C_out, t_hw), lambda nb, t: (nb, 0, t))),
            compiler_params=params,
        )(xp, w_f32 / float(SS), b_f32)
        return out_flat.reshape(N, C_out, H_out, W_out)
    out_flat = pl.pallas_call(
        _legacy_pool_kernel(1.0 / float(SS)),
        out_shape=jax.ShapeDtypeStruct((N, C_in, HW), x.dtype),
        grid_spec=pltpu.PrefetchScalarGridSpec(
            num_scalar_prefetch=0, grid=grid,
            in_specs=[pl.BlockSpec((b_tile, SS, C_in, t_hw), lambda nb, t: (nb, 0, 0, t))],
            out_specs=pl.BlockSpec((b_tile, C_in, t_hw), lambda nb, t: (nb, 0, t))),
        compiler_params=params,
    )(xp)
    return out_flat.reshape(N, C_in, H_out, W_out)


# --------------------------------------------------------------------------------------
# Public wrapper (forward pass of ResidualBlock_highway)
# --------------------------------------------------------------------------------------
def residual_block_highway(x_nchw, conv_weight, conv_bias, *, filters,
                           in_channels, force_1d_conv, stride):
    """x_nchw: (N, C_in, H, W); conv_weight: (C_out, C_in) [or (C_out, C_in, 1, 1)]."""
    N, C_in, H, W = x_nchw.shape
    assert C_in == in_channels
    s = stride if stride > 1 else 1
    assert H % s == 0 and W % s == 0
    apply_conv = (filters != in_channels) or force_1d_conv

    if not apply_conv and s == 1:
        return x_nchw                                   # Identity(Identity(x))

    w = jnp.asarray(conv_weight)
    if w.ndim == 4:
        w = w[:, :, 0, 0]
    w_f32 = w.astype(jnp.float32)
    b_f32 = jnp.asarray(conv_bias).astype(jnp.float32).reshape(-1, 1)
    cap, budget = _vmem_budget()

    if s == 1:                                          # pure 1x1 conv
        return _conv1x1_forward(x_nchw, w_f32, b_f32, cap, budget)

    try:
        # Primary single-HBM-pass path: reads NCHW directly, no wrapper re-layout.
        if apply_conv:
            return _pool_conv_forward(x_nchw, w_f32, b_f32, s, cap, budget)
        return _pool_only_forward(x_nchw, s, cap, budget)
    except Exception:
        # Older jax/Mosaic without strided VMEM loads: previous known-good kernels.
        return _legacy_forward(x_nchw, w_f32, b_f32, s, apply_conv, cap, budget)


def _reference(x_nchw, conv_weight, conv_bias, *, filters, in_channels,
               force_1d_conv, stride):
    """Pure-JAX reference matching the PyTorch module semantics."""
    N, C, H, W = x_nchw.shape
    s = stride if stride > 1 else 1
    xp = x_nchw.reshape(N, C, H // s, s, W // s, s).mean(axis=(3, 5))
    if (filters != in_channels) or force_1d_conv:
        return jnp.einsum('nchw,oc->nohw', xp, conv_weight) + conv_bias[None, :, None, None]
    return xp


if __name__ == "__main__":
    key = jax.random.PRNGKey(0)
    kx, kw, kb = jax.random.split(key, 3)

    batch, in_channels, filters = 2, 4, 8
    H = W = 16
    x = jax.random.normal(kx, (batch, in_channels, H, W), dtype=jnp.float32)
    bound = 1.0 / jnp.sqrt(jnp.float32(in_channels))
    conv_weight = jax.random.uniform(kw, (filters, in_channels), jnp.float32,
                                     minval=-bound, maxval=bound)
    conv_bias = jax.random.uniform(kb, (filters,), jnp.float32,
                                   minval=-bound, maxval=bound)

    # 1) AvgPool(stride=2) + 1x1 conv
    out = residual_block_highway(x, conv_weight, conv_bias, filters=filters,
                                 in_channels=in_channels, force_1d_conv=True, stride=2)
    out = jax.block_until_ready(out)
    ref = _reference(x, conv_weight, conv_bias, filters=filters,
                     in_channels=in_channels, force_1d_conv=True, stride=2)
    assert out.shape == (batch, filters, H // 2, W // 2), out.shape
    assert jnp.allclose(out, ref, atol=1e-5, rtol=1e-5), "pool+conv mismatch vs reference"

    # 2) AvgPool(stride=2) only (identity conv)
    w_id = jnp.zeros((in_channels, in_channels), jnp.float32)
    b_id = jnp.zeros((in_channels,), jnp.float32)
    out2 = residual_block_highway(x, w_id, b_id, filters=in_channels,
                                  in_channels=in_channels, force_1d_conv=False, stride=2)
    out2 = jax.block_until_ready(out2)
    ref2 = _reference(x, w_id, b_id, filters=in_channels,
                      in_channels=in_channels, force_1d_conv=False, stride=2)
    assert out2.shape == (batch, in_channels, H // 2, W // 2), out2.shape
    assert jnp.allclose(out2, ref2, atol=1e-5, rtol=1e-5), "pool-only mismatch vs reference"

    # 3) stride=1 + forced 1x1 conv (conv-only kernel)
    out3 = residual_block_highway(x, conv_weight, conv_bias, filters=filters,
                                  in_channels=in_channels, force_1d_conv=True, stride=1)
    out3 = jax.block_until_ready(out3)
    ref3 = _reference(x, conv_weight, conv_bias, filters=filters,
                      in_channels=in_channels, force_1d_conv=True, stride=1)
    assert out3.shape == (batch, filters, H, W), out3.shape
    assert jnp.allclose(out3, ref3, atol=1e-5, rtol=1e-5), "1x1-conv mismatch vs reference"

    print("KERNEL_OK")
</pallas_src>

<mosaic_0001>
module attributes {stable_mosaic.version = 11 : i64} {
  func.func @kernel(%arg0: i32, %arg1: i32, %arg2: memref<1x4x16x16xf32, #tpu.memory_space<vmem>>, %arg3: memref<16x8xf32, #tpu.memory_space<vmem>>, %arg4: memref<8x4xf32, #tpu.memory_space<vmem>>, %arg5: memref<8x1xf32, #tpu.memory_space<vmem>>, %arg6: memref<1x8x64xf32, #tpu.memory_space<vmem>>, %arg7: memref<4x64xf32, #tpu.memory_space<vmem>>) attributes {dimension_semantics = [#tpu.dimension_semantics<parallel>, #tpu.dimension_semantics<parallel>], iteration_bounds = array<i64: 2, 1>, scalar_prefetch = 0 : i64, scratch_operands = 1 : i64, tpu.core_type = #tpu.core_type<tc>, window_params = [{transform_indices = @transform_0, window_bounds = array<i64: 1, 4, 16, 16>}, {pipeline_mode = #tpu.pipeline_mode<synchronous>, transform_indices = @transform_1, window_bounds = array<i64: 16, 8>}, {pipeline_mode = #tpu.pipeline_mode<synchronous>, transform_indices = @transform_2, window_bounds = array<i64: 8, 4>}, {pipeline_mode = #tpu.pipeline_mode<synchronous>, transform_indices = @transform_3, window_bounds = array<i64: 8, 1>}, {transform_indices = @transform_4, window_bounds = array<i64: 1, 8, 64>}]} {
    %c0 = arith.constant 0 : index
    %c0_0 = arith.constant 0 : index
    %0 = vector.load %arg3[%c0, %c0_0] : memref<16x8xf32, #tpu.memory_space<vmem>>, vector<16x8xf32>
    %c0_1 = arith.constant 0 : index
    %c0_2 = arith.constant 0 : index
    %c0_3 = arith.constant 0 : index
    %c0_4 = arith.constant 0 : index
    %1 = tpu.strided_load %arg2[%c0_1, %c0_2, %c0_3, %c0_4] {strides = array<i32: 1, 1, 2, 1>} : memref<1x4x16x16xf32, #tpu.memory_space<vmem>>, vector<1x4x8x16xf32>
    %2 = vector.shape_cast %1 : vector<1x4x8x16xf32> to vector<4x8x16xf32>
    %c0_5 = arith.constant 0 : index
    %c0_6 = arith.constant 0 : index
    %c1 = arith.constant 1 : index
    %c0_7 = arith.constant 0 : index
    %3 = tpu.strided_load %arg2[%c0_5, %c0_6, %c1, %c0_7] {strides = array<i32: 1, 1, 2, 1>} : memref<1x4x16x16xf32, #tpu.memory_space<vmem>>, vector<1x4x8x16xf32>
    %4 = vector.shape_cast %3 : vector<1x4x8x16xf32> to vector<4x8x16xf32>
    %5 = arith.addf %2, %4 : vector<4x8x16xf32>
    %6 = vector.shape_cast %5 : vector<4x8x16xf32> to vector<32x16xf32>
    %cst = arith.constant dense<0.000000e+00> : vector<32x8xf32>
    %7 = tpu.matmul %6, %0, %cst {dimension_numbers = #tpu.dot_dimension_numbers<[1], [0], [0], [1], [0, 0, 1, 1], [], []>} : vector<32x16xf32>, vector<16x8xf32>, vector<32x8xf32> -> vector<32x8xf32>
    %8 = vector.shape_cast %7 : vector<32x8xf32> to vector<4x8x8xf32>
    %9 = vector.extract_strided_slice %8 {offsets = [0, 0, 0], sizes = [4, 1, 8], strides = [1, 1, 1]} : vector<4x8x8xf32> to vector<4x1x8xf32>
    %10 = vector.shape_cast %9 : vector<4x1x8xf32> to vector<4x8xf32>
    %c0_8 = arith.constant 0 : index
    %c0_9 = arith.constant 0 : index
    %11 = vector.load %arg7[%c0_8, %c0_9] : memref<4x64xf32, #tpu.memory_space<vmem>>, vector<4x8xf32>
    tpu.vector_store %arg7[%c0_8, %c0_9], %10 {strides = array<i32>} : memref<4x64xf32, #tpu.memory_space<vmem>>, vector<4x8xf32>,
    %12 = vector.extract_strided_slice %8 {offsets = [0, 1, 0], sizes = [4, 1, 8], strides = [1, 1, 1]} : vector<4x8x8xf32> to vector<4x1x8xf32>
    %13 = vector.shape_cast %12 : vector<4x1x8xf32> to vector<4x8xf32>
    %c0_10 = arith.constant 0 : index
    %c8 = arith.constant 8 : index
    %14 = vector.load %arg7[%c0_10, %c8] : memref<4x64xf32, #tpu.memory_space<vmem>>, vector<4x8xf32>
    tpu.vector_store %arg7[%c0_10, %c8], %13 {strides = array<i32>} : memref<4x64xf32, #tpu.memory_space<vmem>>, vector<4x8xf32>,
    %15 = vector.extract_strided_slice %8 {offsets = [0, 2, 0], sizes = [4, 1, 8], strides = [1, 1, 1]} : vector<4x8x8xf32> to vector<4x1x8xf32>
    %16 = vector.shape_cast %15 : vector<4x1x8xf32> to vector<4x8xf32>
    %c0_11 = arith.constant 0 : index
    %c16 = arith.constant 16 : index
    %17 = vector.load %arg7[%c0_11, %c16] : memref<4x64xf32, #tpu.memory_space<vmem>>, vector<4x8xf32>
    tpu.vector_store %arg7[%c0_11, %c16], %16 {strides = array<i32>} : memref<4x64xf32, #tpu.memory_space<vmem>>, vector<4x8xf32>,
    %18 = vector.extract_strided_slice %8 {offsets = [0, 3, 0], sizes = [4, 1, 8], strides = [1, 1, 1]} : vector<4x8x8xf32> to vector<4x1x8xf32>
    %19 = vector.shape_cast %18 : vector<4x1x8xf32> to vector<4x8xf32>
    %c0_12 = arith.constant 0 : index
    %c24 = arith.constant 24 : index
    %20 = vector.load %arg7[%c0_12, %c24] : memref<4x64xf32, #tpu.memory_space<vmem>>, vector<4x8xf32>
    tpu.vector_store %arg7[%c0_12, %c24], %19 {strides = array<i32>} : memref<4x64xf32, #tpu.memory_space<vmem>>, vector<4x8xf32>,
    %21 = vector.extract_strided_slice %8 {offsets = [0, 4, 0], sizes = [4, 1, 8], strides = [1, 1, 1]} : vector<4x8x8xf32> to vector<4x1x8xf32>
    %22 = vector.shape_cast %21 : vector<4x1x8xf32> to vector<4x8xf32>
    %c0_13 = arith.constant 0 : index
    %c32 = arith.constant 32 : index
    %23 = vector.load %arg7[%c0_13, %c32] : memref<4x64xf32, #tpu.memory_space<vmem>>, vector<4x8xf32>
    tpu.vector_store %arg7[%c0_13, %c32], %22 {strides = array<i32>} : memref<4x64xf32, #tpu.memory_space<vmem>>, vector<4x8xf32>,
    %24 = vector.extract_strided_slice %8 {offsets = [0, 5, 0], sizes = [4, 1, 8], strides = [1, 1, 1]} : vector<4x8x8xf32> to vector<4x1x8xf32>
    %25 = vector.shape_cast %24 : vector<4x1x8xf32> to vector<4x8xf32>
    %c0_14 = arith.constant 0 : index
    %c40 = arith.constant 40 : index
    %26 = vector.load %arg7[%c0_14, %c40] : memref<4x64xf32, #tpu.memory_space<vmem>>, vector<4x8xf32>
    tpu.vector_store %arg7[%c0_14, %c40], %25 {strides = array<i32>} : memref<4x64xf32, #tpu.memory_space<vmem>>, vector<4x8xf32>,
    %27 = vector.extract_strided_slice %8 {offsets = [0, 6, 0], sizes = [4, 1, 8], strides = [1, 1, 1]} : vector<4x8x8xf32> to vector<4x1x8xf32>
    %28 = vector.shape_cast %27 : vector<4x1x8xf32> to vector<4x8xf32>
    %c0_15 = arith.constant 0 : index
    %c48 = arith.constant 48 : index
    %29 = vector.load %arg7[%c0_15, %c48] : memref<4x64xf32, #tpu.memory_space<vmem>>, vector<4x8xf32>
    tpu.vector_store %arg7[%c0_15, %c48], %28 {strides = array<i32>} : memref<4x64xf32, #tpu.memory_space<vmem>>, vector<4x8xf32>,
    %30 = vector.extract_strided_slice %8 {offsets = [0, 7, 0], sizes = [4, 1, 8], strides = [1, 1, 1]} : vector<4x8x8xf32> to vector<4x1x8xf32>
    %31 = vector.shape_cast %30 : vector<4x1x8xf32> to vector<4x8xf32>
    %c0_16 = arith.constant 0 : index
    %c56 = arith.constant 56 : index
    %32 = vector.load %arg7[%c0_16, %c56] : memref<4x64xf32, #tpu.memory_space<vmem>>, vector<4x8xf32>
    tpu.vector_store %arg7[%c0_16, %c56], %31 {strides = array<i32>} : memref<4x64xf32, #tpu.memory_space<vmem>>, vector<4x8xf32>,
    %c0_17 = arith.constant 0 : index
    %c0_18 = arith.constant 0 : index
    %33 = vector.load %arg4[%c0_17, %c0_18] : memref<8x4xf32, #tpu.memory_space<vmem>>, vector<8x4xf32>
    %c0_19 = arith.constant 0 : index
    %c0_20 = arith.constant 0 : index
    %34 = vector.load %arg7[%c0_19, %c0_20] : memref<4x64xf32, #tpu.memory_space<vmem>>, vector<4x64xf32>
    %cst_21 = arith.constant dense<0.000000e+00> : vector<8x64xf32>
    %35 = tpu.matmul %33, %34, %cst_21 {dimension_numbers = #tpu.dot_dimension_numbers<[1], [0], [0], [1], [0, 0, 1, 1], [], []>} : vector<8x4xf32>, vector<4x64xf32>, vector<8x64xf32> -> vector<8x64xf32>
    %c0_22 = arith.constant 0 : index
    %c0_23 = arith.constant 0 : index
    %36 = vector.load %arg5[%c0_22, %c0_23] : memref<8x1xf32, #tpu.memory_space<vmem>>, vector<8x1xf32>
    %37 = vector.broadcast %36 : vector<8x1xf32> to vector<8x64xf32>
    %38 = arith.addf %35, %37 : vector<8x64xf32>
    %c0_24 = arith.constant 0 : index
    %c0_25 = arith.constant 0 : index
    %c0_26 = arith.constant 0 : index
    %39 = vector.load %arg6[%c0_24, %c0_25, %c0_26] : memref<1x8x64xf32, #tpu.memory_space<vmem>>, vector<1x8x64xf32>
    %40 = vector.shape_cast %39 : vector<1x8x64xf32> to vector<8x64xf32>
    %41 = vector.shape_cast %38 : vector<8x64xf32> to vector<1x8x64xf32>
    tpu.vector_store %arg6[%c0_24, %c0_25, %c0_26], %41 {strides = array<i32>} : memref<1x8x64xf32, #tpu.memory_space<vmem>>, vector<1x8x64xf32>,
    return
  }
  func.func @transform_0(%arg0: i32, %arg1: i32) -> (i32, i32, i32, i32) {
    %c0_i32 = arith.constant 0 : i32
    %c0_i32_0 = arith.constant 0 : i32
    %c0_i32_1 = arith.constant 0 : i32
    return %arg0, %c0_i32, %arg1, %c0_i32_0 : i32, i32, i32, i32
  }
  func.func @transform_1(%arg0: i32, %arg1: i32) -> (i32, i32) {
    %c0_i32 = arith.constant 0 : i32
    %c0_i32_0 = arith.constant 0 : i32
    %c0_i32_1 = arith.constant 0 : i32
    return %c0_i32, %c0_i32_0 : i32, i32
  }
  func.func @transform_2(%arg0: i32, %arg1: i32) -> (i32, i32) {
    %c0_i32 = arith.constant 0 : i32
    %c0_i32_0 = arith.constant 0 : i32
    %c0_i32_1 = arith.constant 0 : i32
    return %c0_i32, %c0_i32_0 : i32, i32
  }
  func.func @transform_3(%arg0: i32, %arg1: i32) -> (i32, i32) {
    %c0_i32 = arith.constant 0 : i32
    %c0_i32_0 = arith.constant 0 : i32
    %c0_i32_1 = arith.constant 0 : i32
    return %c0_i32, %c0_i32_0 : i32, i32
  }
  func.func @transform_4(%arg0: i32, %arg1: i32) -> (i32, i32, i32) {
    %c0_i32 = arith.constant 0 : i32
    %c0_i32_0 = arith.constant 0 : i32
    return %arg0, %c0_i32, %arg1 : i32, i32, i32
  }
}

module attributes {stable_mosaic.version = 11 : i64} {
  func.func @_legacy_pool_conv_kernel(%arg0: i32, %arg1: i32, %arg2: memref<2x4x4x64xf32, #tpu.memory_space<vmem>>, %arg3: memref<8x4xf32, #tpu.memory_space<vmem>>, %arg4: memref<8x1xf32, #tpu.memory_space<vmem>>, %arg5: memref<2x8x64xf32, #tpu.memory_space<vmem>>) attributes {dimension_semantics = [#tpu.dimension_semantics<parallel>, #tpu.dimension_semantics<parallel>], iteration_bounds = array<i64: 1, 1>, scalar_prefetch = 0 : i64, scratch_operands = 0 : i64, tpu.core_type = #tpu.core_type<tc>, window_params = [{transform_indices = @transform_0, window_bounds = array<i64: 2, 4, 4, 64>}, {pipeline_mode = #tpu.pipeline_mode<synchronous>, transform_indices = @transform_1, window_bounds = array<i64: 8, 4>}, {pipeline_mode = #tpu.pipeline_mode<synchronous>, transform_indices = @transform_2, window_bounds = array<i64: 8, 1>}, {transform_indices = @transform_3, window_bounds = array<i64: 2, 8, 64>}]} {
    %c0 = arith.constant 0 : index
    %c0_0 = arith.constant 0 : index
    %0 = vector.load %arg3[%c0, %c0_0] : memref<8x4xf32, #tpu.memory_space<vmem>>, vector<8x4xf32>
    %c0_1 = arith.constant 0 : index
    %c0_2 = arith.constant 0 : index
    %1 = vector.load %arg4[%c0_1, %c0_2] : memref<8x1xf32, #tpu.memory_space<vmem>>, vector<8x1xf32>
    %c0_3 = arith.constant 0 : index
    %c0_4 = arith.constant 0 : index
    %c0_5 = arith.constant 0 : index
    %c0_6 = arith.constant 0 : index
    %2 = vector.load %arg2[%c0_3, %c0_4, %c0_5, %c0_6] : memref<2x4x4x64xf32, #tpu.memory_space<vmem>>, vector<1x4x4x64xf32>
    %3 = vector.shape_cast %2 : vector<1x4x4x64xf32> to vector<4x4x64xf32>
    %cst = arith.constant dense<0.000000e+00> : vector<4x64xf32>
    %4 = vector.multi_reduction <add>, %3, %cst [0] : vector<4x4x64xf32> to vector<4x64xf32>
    %cst_7 = arith.constant dense<0.000000e+00> : vector<8x64xf32>
    %5 = tpu.matmul %0, %4, %cst_7 {dimension_numbers = #tpu.dot_dimension_numbers<[1], [0], [0], [1], [0, 0, 1, 1], [], []>} : vector<8x4xf32>, vector<4x64xf32>, vector<8x64xf32> -> vector<8x64xf32>
    %6 = vector.broadcast %1 : vector<8x1xf32> to vector<8x64xf32>
    %7 = arith.addf %5, %6 : vector<8x64xf32>
    %c0_8 = arith.constant 0 : index
    %c0_9 = arith.constant 0 : index
    %c0_10 = arith.constant 0 : index
    %8 = vector.load %arg5[%c0_8, %c0_9, %c0_10] : memref<2x8x64xf32, #tpu.memory_space<vmem>>, vector<1x8x64xf32>
    %9 = vector.shape_cast %8 : vector<1x8x64xf32> to vector<8x64xf32>
    %10 = vector.shape_cast %7 : vector<8x64xf32> to vector<1x8x64xf32>
    tpu.vector_store %arg5[%c0_8, %c0_9, %c0_10], %10 {strides = array<i32>} : memref<2x8x64xf32, #tpu.memory_space<vmem>>, vector<1x8x64xf32>,
    %c1 = arith.constant 1 : index
    %c0_11 = arith.constant 0 : index
    %c0_12 = arith.constant 0 : index
    %c0_13 = arith.constant 0 : index
    %11 = vector.load %arg2[%c1, %c0_11, %c0_12, %c0_13] : memref<2x4x4x64xf32, #tpu.memory_space<vmem>>, vector<1x4x4x64xf32>
    %12 = vector.shape_cast %11 : vector<1x4x4x64xf32> to vector<4x4x64xf32>
    %cst_14 = arith.constant dense<0.000000e+00> : vector<4x64xf32>
    %13 = vector.multi_reduction <add>, %12, %cst_14 [0] : vector<4x4x64xf32> to vector<4x64xf32>
    %cst_15 = arith.constant dense<0.000000e+00> : vector<8x64xf32>
    %14 = tpu.matmul %0, %13, %cst_15 {dimension_numbers = #tpu.dot_dimension_numbers<[1], [0], [0], [1], [0, 0, 1, 1], [], []>} : vector<8x4xf32>, vector<4x64xf32>, vector<8x64xf32> -> vector<8x64xf32>
    %15 = vector.broadcast %1 : vector<8x1xf32> to vector<8x64xf32>
    %16 = arith.addf %14, %15 : vector<8x64xf32>
    %c1_16 = arith.constant 1 : index
    %c0_17 = arith.constant 0 : index
    %c0_18 = arith.constant 0 : index
    %17 = vector.load %arg5[%c1_16, %c0_17, %c0_18] : memref<2x8x64xf32, #tpu.memory_space<vmem>>, vector<1x8x64xf32>
    %18 = vector.shape_cast %17 : vector<1x8x64xf32> to vector<8x64xf32>
    %19 = vector.shape_cast %16 : vector<8x64xf32> to vector<1x8x64xf32>
    tpu.vector_store %arg5[%c1_16, %c0_17, %c0_18], %19 {strides = array<i32>} : memref<2x8x64xf32, #tpu.memory_space<vmem>>, vector<1x8x64xf32>,
    return
  }
  func.func @transform_0(%arg0: i32, %arg1: i32) -> (i32, i32, i32, i32) {
    %c0_i32 = arith.constant 0 : i32
    %c0_i32_0 = arith.constant 0 : i32
    %c0_i32_1 = arith.constant 0 : i32
    return %arg0, %c0_i32, %c0_i32_0, %arg1 : i32, i32, i32, i32
  }
  func.func @transform_1(%arg0: i32, %arg1: i32) -> (i32, i32) {
    %c0_i32 = arith.constant 0 : i32
    %c0_i32_0 = arith.constant 0 : i32
    %c0_i32_1 = arith.constant 0 : i32
    return %c0_i32, %c0_i32_0 : i32, i32
  }
  func.func @transform_2(%arg0: i32, %arg1: i32) -> (i32, i32) {
    %c0_i32 = arith.constant 0 : i32
    %c0_i32_0 = arith.constant 0 : i32
    %c0_i32_1 = arith.constant 0 : i32
    return %c0_i32, %c0_i32_0 : i32, i32
  }
  func.func @transform_3(%arg0: i32, %arg1: i32) -> (i32, i32, i32) {
    %c0_i32 = arith.constant 0 : i32
    %c0_i32_0 = arith.constant 0 : i32
    return %arg0, %c0_i32, %arg1 : i32, i32, i32
  }
}

</mosaic_0001>

<bundles_post_ra>
// kernel: tpu_custom_call.1
= control target key start
LH: loop header
LB: loop body
LE: loop exit
PB: predicated region body
PF: predicated region fallthrough
CT: control target
= control target key end

     0   :  { %9 = vsyncpa [#allocation4], 0  ;;  %s940_s0 = inlined_call_operand.hbm [shape: f32[2,4,16,16], index: 0, kind: input, shape index: {}]   ;;  %s941_s1 = inlined_call_operand.vmem [shape: f32[16,8], index: 1, kind: input, shape index: {}]   ;;  %s942_s2 = inlined_call_operand.vmem [shape: f32[8,4], index: 2, kind: input, shape index: {}]   ;;  %s943_s3 = inlined_call_operand.vmem [shape: f32[8,1], index: 3, kind: input, shape index: {}]   ;;  %s944_s4 = inlined_call_operand.hbm [shape: f32[2,8,64], index: 4, kind: output, shape index: {}]  }
   0x1   :  { %11 = vsyncpa [#allocation4 + $0x1], 0 }
   0x2   :  { %12 = vsyncpa [#allocation5], 0 }
   0x3   :  { %14 = vsyncpa [#allocation5 + $0x1], 0  ;;  %s780_s15 = smov 0   ;;  %s782_s16 = smov 0  }
   0x4   :  { %s784_s17 = smov 0   ;;  %s786_s18 = smov 0  }
   0x5   :  { %s788_s19 = smov 0   ;;  %s790_s20 = smov 0  }
   0x6 LB: > { %s525_s21 = sadd.s32 4294967295, %s743_s20   ;;  %s526_s22 = sadd.s32 4294967294, %s743_s20   ;;  %s743_s20 = sphi %s790_s20, %s20_s20   ;;  %s739_s19 = sphi %s788_s19, %s953_s19   ;;  %s735_s18 = sphi %s786_s18, %s952_s18   ;;  %s731_s17 = sphi %s784_s17, %s951_s17   ;;  %s727_s16 = sphi %s782_s16, %s950_s16   ;;  %s723_s15 = sphi %s780_s15, %s949_s15  }
   0x7   : > { %s32_s23 = sadd.s32 1, %s739_s19  ;;  %s41_s24 = sadd.s32 1, %s731_s17 }
   0x8   : > { %p34_p0 = scmp.ge.s32.totalorder %s32_s23, 2  ;;  %p48_p1 = scmp.ne.s32.totalorder %s731_s17, %s727_s16 }
   0x9   : > { %p49_p2 = scmp.eq.s32.totalorder %s743_s20, 0  ;;  %p54_p3 = scmp.ne.s32.totalorder %s727_s16, %s723_s15 }
   0xa   : > { %s955_s23 = smov (%p34_p0, %s32_s23), 0  ;;  %p55_p5 = scmp.eq.s32.totalorder %s525_s21, 0 }
   0xb   : > { %p821_p4 = por %p49_p2, %p48_p1  ;;  %s36_s26 = ssub.s32 %s739_s19, %s955_s23 }
   0xc   : > { %p143_p6 = scmp.eq.s32.totalorder %s525_s21, 1  ;;  %p39_p7 = scmp.eq.s32.totalorder %s36_s26, 0 }
   0xd   : > { %p827_p8 = por %p55_p5, %p54_p3  ;;  %p149_p10 = scmp.eq.s32.totalorder %s526_s22, 1 }
   0xe   : > { %p831_p9 = por %p143_p6, %p48_p1  ;;  %p528_p12 = scmp.ge.s32.totalorder %s743_s20, 2 }
   0xf   : > { %s836_s29 = scalar_select %p39_p7, %s731_s17, %s41_s24  }
  0x10   : > { %p838_p11 = por %p149_p10, %p54_p3  ;;  %p569_p13 = scmp.lt.s32.totalorder %s743_s20, 2 }
  0x11   : > { %s178_s5 = sand.u32 1, %s731_s17   ;;  %s552_s7 = sshll.u32 %s739_s19, 6 }
  0x12   : > { %s529_s6 = sshll.u32 %s178_s5, 6  ;;  %s189_s10 = scalar_lea.hbm %s940_s0, %s552_s7 }
  0x13   : > { %s182_s11 = scalar_lea.vmem [#allocation3], %s529_s6  ;;  %s190_s13 = sshll.u32 %s189_s10, 4  ;;  %s191_s13 = int_to_ptr.hbm [resolvable:$true] %s190_s13 }
  0x14   : > { %s192_s12 = sshll.u32 %s182_s11, 4  ;;  %p562_p0 = pnand %p569_p13, %p821_p4  ;;  %s193_s12 = int_to_ptr.vmem [resolvable:$true] %s192_s12 }
  0x15   : > { %p532_p1 = scmp.ge.s32.totalorder %s743_s20, 1  ;;  %s179_s14 = scalar_lea.sflag [#allocation4], %s178_s5 }
  0x16   : > { %s745_s21 = smov 128   ;;  %s746_s22 = smov 8  }
  0x17   : > { %564 = dma.hbm_to_vmem [thread:$0]  (!%p562_p0), %s191_s13, 1024, %s193_s12, %s179_s14, %s745_s21, %s745_s21, %s746_s22  }
  0x18   : > { %p200_p2 = scmp.lt.s32.totalorder %s743_s20, 3 }
  0x1a   : > { %p201_p3 = pnand %p532_p1, %p200_p2 }
  0x1b   : > { %s854_s24 = sand.u32 (!%p201_p3), 1, %s727_s16  }
  0x1c   : > { %204 = sbr.rel (%p201_p3) target bundleno = 454 (0x1c6), region = 36  ;;  %s533_s26 = sshll.u32 (!%p201_p3), %s854_s24, 6 }
  0x1d   : > { %s207_s6 = scalar_lea.sflag (!%p201_p3), [#allocation4], %s854_s24  ;;  %s210_s7 = scalar_lea.vmem (!%p201_p3), [#allocation3], %s533_s26 }
  0x21   : > { %714 = dma.done.wait (%p827_p8), %s207_s6, 1024  }
  0x22   : > { %716 = vsyncadd (%p827_p8), %s207_s6, 4294966272  ;;  %v238_v0 = vld [vmem:[%s941_s1 + $0x8] sm:$0xff]  ;;  %v237_v1 = vld [vmem:[%s941_s1] sm:$0xff]  ;;  %vm258_vm0 = vcmask 130048   ;;  %vm345_vm1 = vcmask 1047559   ;;  %vm336_vm2 = vcmask 1046534  }
  0x23   : > { %v535_v2 = vld [vmem:[%s210_s7 + $0x10] ss:$2 sm:$0xff]  ;;  %553 = vmatpush.msra.mxu2 %v238_v0  ;;  %554 = vmatpush.msra.mxu3 %v238_v0  ;;  %v539_v3 = vld [vmem:[%s210_s7 + $0x11] ss:$2 sm:$0xff]  ;;  %v536_v4 = vld [vmem:[%s210_s7 + $0x20] ss:$2 sm:$0xff] }
  0x24   : > { %v540_v5 = vld [vmem:[%s210_s7 + $0x21] ss:$2 sm:$0xff]  ;;  %v255_v6 = vadd.f32 %v539_v3, %v535_v2  ;;  %285 = vmatpush.msra.mxu0 %v238_v0  ;;  %v239_v8 = vld [vmem:[%s210_s7] ss:$2 sm:$0xff]  ;;  %v537_v11 = vld [vmem:[%s210_s7 + $0x30] ss:$2 sm:$0xff] }
  0x25   : > { %v256_v7 = vadd.f32 %v540_v5, %v536_v4  ;;  %v538_v9 = vld [vmem:[%s210_s7 + $0x1] ss:$2 sm:$0xff]  ;;  %555 = vmatpush.msra.mxu2 %v237_v1  ;;  %556 = vmatpush.msra.mxu3 %v237_v1  ;;  %v541_v12 = vld [vmem:[%s210_s7 + $0x31] ss:$2 sm:$0xff]  ;;  %s747_s27 = smov 48   ;;  %vm318_vm3 = vcmask 1044484  }
  0x26   : > { %v254_v10 = vadd.f32 %v538_v9, %v239_v8  ;;  %543 = vmatmul.msk.f32.vlgmr.msra.gmra.mxu2 %vm258_vm0, %v255_v6  ;;  %286 = vmatpush.msra.mxu0 %v237_v1  ;;  %v257_v13 = vadd.f32 %v541_v12, %v537_v11  ;;  %vm308_vm4 = vcmask 1042434   ;;  %s748_s10 = smov 40   ;;  %vm305_vm5 = vcmask 1041409   ;;  %s749_s11 = smov 24   ;;  %v390_v44 = vld [vmem:[%s943_s3] sm:$0xff] }
  0x27   : > { %544 = vmatmul.msk.f32.vlgmr.msra.gmra.mxu3 %vm258_vm0, %v256_v7  ;;  %vm327_vm6 = vcmask 1045509   ;;  %vm311_vm7 = vcmask 1043459   ;;  %vm314_vm8 = vcmask 60416   ;;  %s750_s12 = smov 8   ;;  %s751_s13 = smov 32   ;;  %v754_v45 = vmov 0  }
  0x28   : > { %542 = vmatmul.msk.f32.vlgmr.msra.gmra.mxu0 %vm258_vm0, %v254_v10  ;;  %s752_s14 = smov 16   ;;  %s753_s21 = smov 56   ;;  %629 = vset.pattern.permute.xlu1 %v754_v45  ;;  %vm323_vm9 = vcmask 127041   ;;  %vm332_vm10 = vcmask 193666   ;;  %vm341_vm11 = vcmask 260291   ;;  %vm350_vm12 = vcmask 326916  }
  0x29   : > { %630 = vset.pattern.permute.xlu0 %v754_v45  ;;  %vm360_vm13 = vcmask 392517   ;;  %vm362_vm14 = vcmask 385344   ;;  %vm372_vm15 = vcmask 458118   ;;  %v388_v54 = vld [vmem:[%s942_s2] sm:$0xff]  ;;  %s534_s25 = sshll.u32 %s854_s24, 3  ;;  %s549_s5 = sshll.u32 %s735_s18, 3 }
  0x2a   : > { %s681_s26 = scalar_lea.hbm %s944_s4, 16 }
  0x2f   : > { %545 = vmatmul.msk.f32.gmra.mxu3 %vm258_vm0, %v257_v13  ;;  %vm384_vm0 = vcmask 523719  }
  0xa5   : > { %v288_v14 = vpop.f32.mrf.mxu0 }
  0xa9   : > { %v291_v15 = vpop.f32.mrf.mxu2 }
  0xaa   : > { %v294_v16 = vpop.f32.mrf.mxu3  ;;  %v304_v17 = vrot.slane %v291_v15, 7 }
  0xab   : > { %v307_v18 = vrot.slane %v294_v16, 6 }
  0xac   : > { %v364_v19 = vsel %vm345_vm1, %v304_v17, %v288_v14  ;;  %v352_v20 = vsel %vm336_vm2, %v304_v17, %v288_v14  ;;  %v334_v22 = vsel %vm318_vm3, %v304_v17, %v288_v14  ;;  %v316_v23 = vsel %vm308_vm4, %v304_v17, %v288_v14 }
  0xad   : > { %366 = vrot.lane.b32.xlu0 %v364_v19, %s747_s27  ;;  %v353_v21 = vsel %vm345_vm1, %v307_v18, %v352_v20  ;;  %v306_v25 = vsel %vm305_vm5, %v304_v17, %v288_v14  ;;  %v335_v27 = vsel %vm327_vm6, %v307_v18, %v334_v22  ;;  %v317_v28 = vsel %vm311_vm7, %v307_v18, %v316_v23 }
  0xae   : > { %354 = vrot.lane.b32.xlu2 %v353_v21, %s748_s10  ;;  %v309_v31 = vsel %vm308_vm4, %v307_v18, %v306_v25  ;;  %v343_v33 = vsel %vm327_vm6, %v304_v17, %v288_v14  ;;  %v325_v34 = vsel %vm311_vm7, %v304_v17, %v288_v14  ;;  %v376_v39 = vsel %vm305_vm5, %v307_v18, %v304_v17 }
  0xaf   : > { %v344_v35 = vsel %vm336_vm2, %v307_v18, %v343_v33  ;;  %v326_v36 = vsel %vm318_vm3, %v307_v18, %v325_v34 }
  0xb2   : > { %v297_v24 = vpop.f32.mrf.mxu3 }
  0xb3   : > { %v310_v26 = vrot.slane %v297_v24, 5 }
  0xb5   : > { %v337_v29 = vsel %vm336_vm2, %v310_v26, %v335_v27  ;;  %v319_v30 = vsel %vm318_vm3, %v310_v26, %v317_v28  ;;  %v312_v32 = vsel %vm311_vm7, %v310_v26, %v309_v31  ;;  %v346_v37 = vsel %vm345_vm1, %v310_v26, %v344_v35 }
  0xb6   : > { %338 = vrot.lane.b32.xlu1 %v337_v29, %s749_s11  ;;  %320 = vrot.lane.b32.xlu0 %v319_v30, %s750_s12  ;;  %315 = vst.msk [vmem:[#allocation2] sm:$0xf] %vm314_vm8, %v312_v32  ;;  %v328_v38 = vsel %vm327_vm6, %v310_v26, %v326_v36  ;;  %v365_v40 = vsel %vm305_vm5, %v310_v26, %v307_v18  ;;  %vm374_vm1 = vcmask 451968   ;;  %vm386_vm2 = vcmask 518592  }
  0xb7   : > { %356 = vrot.lane.b32.xlu2 %v310_v26, %s748_s10  ;;  %v377_v41 = vsel %vm308_vm4, %v310_v26, %v376_v39  ;;  %vm400_vm3 = vcmask 1043456   ;;  %vm396_vm4 = vcmask 31744   ;;  %s235_s10 = scalar_lea.vmem [#allocation6], %s534_s25  ;;  %vm424_vm5 = vcmask 523264  }
  0xb8   : > { %s440_s11 = sshll.u32 %s235_s10, 4  ;;  %s441_s11 = int_to_ptr.vmem [resolvable:$true] %s440_s11 }
  0xbe   : > { %347 = vrot.lane.b32.xlu1 %v346_v37, %s751_s13  ;;  %329 = vrot.lane.b32.xlu0 %v328_v38, %s752_s14  ;;  %s427_s13 = scalar_lea.sflag [#allocation5], %s854_s24 }
  0xbf   : > { %378 = vrot.lane.b32.xlu2 %v288_v14, %s753_s21 }
  0xc6   : > { %368 = vrot.lane.b32.xlu1 %v365_v40, %s747_s27  ;;  %380 = vrot.lane.b32.xlu0 %v377_v41, %s753_s21  ;;  %s438_s27 = scalar_lea.hbm %s944_s4, %s549_s5 }
  0xc7   : > { %s442_s12 = sshll.u32 %s438_s27, 4  ;;  %s443_s12 = int_to_ptr.hbm [resolvable:$true] %s442_s12 }
  0xc8   : > { %s675_s14 = sshra.s32 %s443_s12, 4  ;;  %s676_s14 = int_to_ptr.hbm [resolvable:$true] %s675_s14 }
  0xc9   : > { %s677_s21 = scalar_lea.hbm %s676_s14, 8  ;;  %p682_p7 = scmp.lt.s32.totalorder %s676_s14, %s944_s4 }
  0xca   : > { %p678_p4 = scmp.ne.s32.totalorder %s676_s14, %s677_s21  ;;  %p683_p8 = scmp.lt.s32.totalorder %s681_s26, %s677_s21 }
  0xcc   : > { %p679_p5 = pnand %p678_p4, %p831_p9  ;;  %p684_p10 = por %p683_p8, %p682_p7 }
  0xce   : > { %393 = vperm.xlu1 %629, %v390_v44   ;;  %p680_p6 = pneg %p679_p5 }
  0xd0   : > { %p685_p13 = pnand %p684_p10, %p680_p6 }
 0x108   : > { %v355_v43 = vpop.permute.xlu2 %354 }
 0x111   : > { %v357_v48 = vpop.permute.xlu2 %356 }
 0x119   : > { %v379_v51 = vpop.permute.xlu2 %378 }
 0x11f   : > { %v367_v42 = vpop.permute.xlu0 %366 }
 0x128   : > { %v339_v46 = vpop.permute.xlu1 %338  ;;  %v321_v47 = vpop.permute.xlu0 %320 }
 0x129   : > { %324 = vst.msk [vmem:[#allocation2 - $0x1] sm:$0x1e] %vm323_vm9, %v321_v47 }
 0x130   : > { %v348_v49 = vpop.permute.xlu1 %347  ;;  %v330_v50 = vpop.permute.xlu0 %329 }
 0x131   : > { %333 = vst.msk [vmem:[#allocation2 - $0x2] sm:$0x3c] %vm332_vm10, %v330_v50 }
 0x132   : > { %342 = vst.msk [vmem:[#allocation2 - $0x3] sm:$0x78] %vm341_vm11, %v339_v46 }
 0x133   : > { %351 = vst.msk [vmem:[#allocation2 - $0x4] sm:$0xf0] %vm350_vm12, %v348_v49 }
 0x134   : > { %361 = vst.msk [vmem:[#allocation2 - $0x5] sm:$0xe0] %vm360_vm13, %v355_v43 }
 0x135   : > { %363 = vst.msk [vmem:[#allocation2 + $0x3] sm:$0x1] %vm362_vm14, %v357_v48 }
 0x136   : > { %373 = vst.msk [vmem:[#allocation2 - $0x6] sm:$0xc0] %vm372_vm15, %v367_v42 }
 0x137   : > { %385 = vst.msk [vmem:[#allocation2 - $0x7] sm:$0x80] %vm384_vm0, %v379_v51 }
 0x138   : > { %v369_v52 = vpop.permute.xlu1 %368  ;;  %v381_v53 = vpop.permute.xlu0 %380 }
 0x139   : > { %375 = vst.msk [vmem:[#allocation2 + $0x2] sm:$0x3] %vm374_vm1, %v369_v52 }
 0x13a   : > { %387 = vst.msk [vmem:[#allocation2 + $0x1] sm:$0x7] %vm386_vm2, %v381_v53 }
 0x140   : > { %v394_v56 = vpop.permute.xlu1 %393 }
 0x141   : > { %v389_v55 = vld [vmem:[#allocation2] sm:$0xf] }
 0x142   : > { %546 = vmatpush.msk.msra.mxu1 %vm400_vm3, %v389_v55 }
 0x143   : > { %547 = vmatmul.msk.f32.vlgmr.msra.gmra.mxu1 %vm396_vm4, %v388_v54 }
 0x1c0   : > { %v421_v57 = vpop.f32.mrf.mxu1 }
 0x1c1   : > { %v422_v58 = vadd.f32 %v421_v57, %v394_v56 }
 0x1c3   : > { %425 = vst.msk [vmem:[%s235_s10] sm:$0xff] %vm424_vm5, %v422_v58 }
 0x1c4   : > { %688 = shalt.err (!%p685_p13)
}
 0x1c5   : > { %559 = dma.vmem_to_hbm [thread:$0]  (%p831_p9), %s441_s11, 128, %s443_s12, %s427_s13  }
 0x1c6 PF: > { %s454_s24 = sand.u32 1, %s723_s15   ;;  %p566_p0 = pnand %p528_p12, %p838_p11 }
 0x1c7   : > { %s455_s25 = scalar_lea.sflag [#allocation5], %s454_s24 }
 0x1c8   : > { %p567_p1 = pneg %p566_p0 }
 0x1ca   : > { %718 = dma.done.wait (%p567_p1), %s455_s25, 128  }
 0x1cb   : > { %720 = vsyncadd (%p567_p1), %s455_s25, 4294967168  ;;  %s20_s20 = sadd.s32 1, %s743_s20   ;;  %s949_s15 = smov %s727_s16 }
 0x1cc   : > { %p17_p2 = scmp.ge.s32.totalorder %s20_s20, 4   ;;  %s950_s16 = smov %s731_s17 }
 0x1cd   : > { %s951_s17 = smov %s836_s29  ;;  %s952_s18 = smov %s739_s19 }
 0x1ce   : > { %s953_s19 = smov %s955_s23  ;;  %19 = sbr.rel (!%p17_p2) target bundleno = 6 (0x6), region = 88 }
 0x1d3   :  { %461 = vsyncpa [#allocation4], 1 }
 0x1d4   :  { %463 = vsyncpa [#allocation4 + $0x1], 1 }
 0x1d5   :  { %464 = vsyncpa [#allocation5], 1 }
 0x1d6   :  { %466 = vsyncpa [#allocation5 + $0x1], 1 }

// kernel: tpu_custom_call.1
= control target key start
LH: loop header
LB: loop body
LE: loop exit
PB: predicated region body
PF: predicated region fallthrough
CT: control target
= control target key end

     0   :  { %8 = vsyncpa [#allocation3], 0  ;;  %s247_s0 = inlined_call_operand.hbm [shape: f32[2,4,4,64], index: 0, kind: input, shape index: {}]   ;;  %s248_s1 = inlined_call_operand.vmem [shape: f32[8,4], index: 1, kind: input, shape index: {}]   ;;  %s249_s2 = inlined_call_operand.vmem [shape: f32[8,1], index: 2, kind: input, shape index: {}]   ;;  %s250_s3 = inlined_call_operand.hbm [shape: f32[2,8,64], index: 3, kind: output, shape index: {}]  }
   0x1   :  { %9 = vsyncpa [#allocation4], 0  ;;  %s14_s14 = sshll.u32 %s247_s0, 4  ;;  %s200_s15 = smov [#allocation2]   ;;  %s15_s14 = int_to_ptr.hbm [resolvable:$true] %s14_s14 }
   0x2   :  { %s16_s16 = sshll.u32 %s200_s15, 4  ;;  %s201_s17 = smov 64   ;;  %s17_s16 = int_to_ptr.vmem [resolvable:$true] %s16_s16 }
   0x3   :  { %s202_s18 = smov 4  }
   0x4   :  { %22 = dma.hbm_to_vmem [thread:$0]  %s15_s14, 512, %s17_s16, [#allocation3], %s201_s17, %s201_s17, %s202_s18  }
   0x5   :  { %196 = dma.done.wait [#allocation3], 512  }
   0x6   :  { %197 = vsyncadd [#allocation3], 4294966784  ;;  %v203_v0 = vmov 0   ;;  %vm37_vm0 = vcmask 519168   ;;  %v33_v1 = vld [vmem:[#allocation2] sm:$0xf] }
   0x7   :  { %147 = vset.pattern.permute.xlu0 %v203_v0  ;;  %v34_v2 = vld [vmem:[#allocation2 + $0x4] sm:$0xf]  ;;  %v35_v3 = vld [vmem:[#allocation2 + $0x8] sm:$0xf]  ;;  %v36_v4 = vld [vmem:[#allocation2 + $0xc] sm:$0xf] }
   0x8   :  { %v38_v5 = vsel %vm37_vm0, %v33_v1, 0.0  ;;  %v39_v6 = vsel %vm37_vm0, %v34_v2, 0.0  ;;  %v41_v7 = vsel %vm37_vm0, %v35_v3, 0.0  ;;  %v43_v9 = vsel %vm37_vm0, %v36_v4, 0.0  ;;  %v81_v10 = vld [vmem:[#allocation2 + $0x10] sm:$0xf] }
   0x9   :  { %v40_v8 = vadd.f32 %v39_v6, %v38_v5  ;;  %v82_v11 = vld [vmem:[#allocation2 + $0x14] sm:$0xf]  ;;  %v32_v12 = vld [vmem:[%s249_s2] sm:$0xff]  ;;  %v83_v13 = vld [vmem:[#allocation2 + $0x18] sm:$0xf]  ;;  %v85_v15 = vsel %vm37_vm0, %v81_v10, 0.0 }
   0xa   :  { %v84_v14 = vld [vmem:[#allocation2 + $0x1c] sm:$0xf]  ;;  %v86_v16 = vsel %vm37_vm0, %v82_v11, 0.0  ;;  %47 = vperm.xlu0 %147, %v32_v12   ;;  %v88_v19 = vsel %vm37_vm0, %v83_v13, 0.0  ;;  %vm54_vm1 = vcmask 1043456   ;;  %v31_v23 = vld [vmem:[%s248_s1] sm:$0xff] }
   0xb   :  { %v42_v17 = vadd.f32 %v41_v7, %v40_v8  ;;  %v87_v18 = vadd.f32 %v86_v16, %v85_v15  ;;  %v90_v20 = vsel %vm37_vm0, %v84_v14, 0.0  ;;  %vm50_vm2 = vcmask 31744   ;;  %s204_s2 = smov [#allocation5]   ;;  %s123_s25 = sshll.u32 %s250_s3, 4  ;;  %s124_s25 = int_to_ptr.hbm [resolvable:$true] %s123_s25 }
   0xc   :  { %s121_s22 = sshll.u32 %s204_s2, 4  ;;  %vm78_vm3 = vcmask 523264   ;;  %s205_s1 = smov 128   ;;  %s122_s22 = int_to_ptr.vmem [resolvable:$true] %s121_s22 }
   0xd   :  { %v44_v21 = vadd.f32 %v43_v9, %v42_v17  ;;  %v89_v22 = vadd.f32 %v88_v19, %v87_v18  ;;  %s206_s26 = smov 8  }
   0xf   :  { %136 = vmatpush.msk.msra.mxu0 %vm54_vm1, %v44_v21  ;;  %v91_v24 = vadd.f32 %v90_v20, %v89_v22 }
  0x10   :  { %137 = vmatmul.msk.f32.vlgmr.msra.gmra.mxu0 %vm50_vm2, %v31_v23 }
  0x11   :  { %138 = vmatpush.msk.msra.mxu1 %vm54_vm1, %v91_v24 }
  0x12   :  { %139 = vmatmul.msk.f32.vlgmr.msra.gmra.mxu1 %vm50_vm2, %v31_v23 }
  0x7c   :  { %v48_v25 = vpop.permute.xlu0 %47 }
  0x8d   :  { %v75_v26 = vpop.f32.mrf.mxu0 }
  0x8e   :  { %v76_v27 = vadd.f32 %v75_v26, %v48_v25 }
  0x8f   :  { %v112_v28 = vpop.f32.mrf.mxu1 }
  0x90   :  { %79 = vst.msk [vmem:[#allocation5] sm:$0xff] %vm78_vm3, %v76_v27  ;;  %v113_v29 = vadd.f32 %v112_v28, %v48_v25 }
  0x92   :  { %116 = vst.msk [vmem:[#allocation5 + $0x8] sm:$0xff] %vm78_vm3, %v113_v29 }
  0x93   :  { %129 = dma.vmem_to_hbm [thread:$0]  %s122_s22, 256, %s124_s25, [#allocation4], %s205_s1, %s205_s1, %s206_s26  }
  0x94   :  { %198 = dma.done.wait [#allocation4], 256  }
  0x95   :  { %199 = vsyncadd [#allocation4], 4294967040 }
  0x96   :  { %134 = vsyncpa [#allocation3], 1 }
  0x97   :  { %135 = vsyncpa [#allocation4], 1 }

</bundles_post_ra>
